<compile_context>
chip_gen: v6e
topology: v6e:2x2x1
jax: 0.10.0
libtpu: 0.0.40
codegen_flags: <defaults>
</compile_context>

<pallas_src>
import jax
import jax.numpy as jnp
import numpy as np
from jax.experimental import pallas as pl
from jax.experimental.pallas import tpu as pltpu


def locked_dropout_kernel(x_ref, m_ref, o_ref):
    # x_ref/o_ref: (tile_rows, tile_cols); m_ref: (row_align, tile_cols),
    # already scaled by 1/(1-p). Multiply each row_align-row stripe of x by
    # the same full-vreg mask block (avoids a per-stripe sublane broadcast).
    xr = x_ref[...]
    m = m_ref[...]
    rows, cols = xr.shape
    ra = m.shape[0]
    if rows % ra == 0:
        x3 = xr.reshape(rows // ra, ra, cols)
        o_ref[...] = (x3 * m[None, :, :]).reshape(rows, cols)
    else:
        # Small / ragged full-extent time block: plain (1, C) broadcast.
        o_ref[...] = xr * m[:1, :]


def _chip_budgets():
    """Pick (target_block_bytes, vmem_limit_bytes) per TPU generation.

    Fallback (8 MiB tiles, 48 MiB scoped VMEM) is safe on v5e/v6e/v7x:
    double-buffered x + out is 4x tile plus a few KiB of resident mask.
    """
    tile, limit = 8 << 20, 48 << 20
    try:
        info = pltpu.get_tpu_info()
        vmem = getattr(info, "vmem_capacity_bytes", None)
        if vmem is None:
            vmem = getattr(info, "vmem_size_bytes", 0)
        vmem = int(vmem)
        if vmem >= (100 << 20):           # v5e / v6e: 128 MiB physical VMEM
            tile, limit = 16 << 20, 100 << 20
        elif vmem > 0:                    # v7x: 64 MiB per TensorCore
            tile, limit = 10 << 20, 48 << 20
    except Exception:
        pass
    return tile, limit


def locked_dropout(x, key, dropout=0.2, training=True,
                   target_block_bytes=None, vmem_limit_bytes=None,
                   donate_x=False):
    """JAX/Pallas equivalent of LockedDropout.forward(x, dropout).

    x: (T, B, H) = (seq_len, batch, hidden).
    """
    if not training or not dropout:
        return x
    assert 0.0 < dropout < 1.0, "dropout must be in (0, 1)"

    T, B, H = x.shape
    BH = B * H
    keep_prob = 1.0 - float(dropout)

    dtype_bytes = jnp.dtype(x.dtype).itemsize
    if dtype_bytes >= 4:
        row_align = 8        # f32 sublane packing
    elif dtype_bytes == 2:
        row_align = 16       # bf16 packs 2 rows per sublane
    else:
        row_align = 32       # int8 / fp8 pack 4 rows per sublane

    auto_tile, auto_limit = _chip_budgets()
    if target_block_bytes is None:
        target_block_bytes = auto_tile
    if vmem_limit_bytes is None:
        vmem_limit_bytes = auto_limit

    # ---- Column (lane) tiling: full BH if it fits, else multiples of 128 ----
    if row_align * BH * dtype_bytes <= target_block_bytes or BH <= 128:
        tile_cols = BH                          # full-extent last dim is legal
    else:
        cols_budget = target_block_bytes // (row_align * dtype_bytes)
        tile_cols = max(128, (cols_budget // 128) * 128)
        if tile_cols >= BH:
            tile_cols = BH

    # ---- Row (time) tiling: fill the budget, but never collapse to 1 step ----
    rows_budget = target_block_bytes // (tile_cols * dtype_bytes)
    tile_rows = max(row_align, (rows_budget // row_align) * row_align)
    if tile_rows >= T:
        if T > 2 * row_align:
            # Keep >= 2 grid steps so block i+1's read overlaps block i's
            # writeback and both v7x TensorCores get work.
            half = (T + 1) // 2
            tile_rows = ((half + row_align - 1) // row_align) * row_align
        else:
            tile_rows = T                       # full-extent block (always legal)

    grid = (pl.cdiv(T, tile_rows), pl.cdiv(BH, tile_cols))

    # ---- Locked mask: sampled once at the true width, scaled in f32 ----
    mask = jax.random.bernoulli(key, keep_prob, (1, BH))
    mask = (mask.astype(jnp.float32) * (1.0 / keep_prob)).astype(x.dtype)
    mask = jnp.broadcast_to(mask, (row_align, BH))   # fill whole sublane vregs

    x2 = x.reshape(T, BH)                            # free collapse, no copy pass

    cost = pl.CostEstimate(
        flops=T * BH,
        transcendentals=0,
        bytes_accessed=2 * T * BH * dtype_bytes + row_align * BH * dtype_bytes,
    )

    out2 = pl.pallas_call(
        locked_dropout_kernel,
        out_shape=jax.ShapeDtypeStruct((T, BH), x.dtype),
        grid_spec=pltpu.PrefetchScalarGridSpec(
            num_scalar_prefetch=0,
            grid=grid,
            in_specs=[
                pl.BlockSpec((tile_rows, tile_cols), lambda t, c: (t, c)),
                pl.BlockSpec((row_align, tile_cols), lambda t, c: (0, c)),
            ],
            out_specs=pl.BlockSpec((tile_rows, tile_cols), lambda t, c: (t, c)),
        ),
        compiler_params=pltpu.CompilerParams(
            # Every grid step is independent -> shard across both TCs on v7x.
            dimension_semantics=("parallel", "parallel"),
            vmem_limit_bytes=int(vmem_limit_bytes),
        ),
        cost_estimate=cost,
        input_output_aliases=({0: 0} if donate_x else {}),
    )(x2, mask)

    return out2.reshape(T, B, H)


def _check_locked(out_np, x_np, keep):
    """Structural checks that don't depend on replicating the RNG."""
    T = out_np.shape[0]
    # Mask is locked across time: out = mask(b,h) * x, so
    # out[t] * x[0] == out[0] * x[t] elementwise.
    for t in range(1, T):
        np.testing.assert_allclose(out_np[t] * x_np[0], out_np[0] * x_np[t],
                                   rtol=1e-5, atol=1e-5)
    # Kept values are scaled by exactly 1/keep; dropped values are 0.
    kept = ~np.isclose(out_np, 0.0)
    np.testing.assert_allclose(out_np[kept], x_np[kept] / keep,
                               rtol=1e-5, atol=1e-5)


if __name__ == "__main__":
    key = jax.random.PRNGKey(0)
    kx, km = jax.random.split(key)

    # Case 1: small lane-dense shape (B*H == 128), default tile budgets.
    T, B, H = 8, 4, 32
    x = jax.random.normal(kx, (T, B, H), dtype=jnp.float32)
    out = jax.block_until_ready(locked_dropout(x, km, dropout=0.2, training=True))

    # Eval mode is identity.
    out_eval = locked_dropout(x, km, dropout=0.2, training=False)
    np.testing.assert_array_equal(np.asarray(out_eval), np.asarray(x))
    _check_locked(np.asarray(out), np.asarray(x), keep=0.8)

    # Case 2: ragged shape (T % 8 != 0, B*H % 128 != 0) with a tiny tile
    # budget to force a 2-D grid and ragged edge blocks in both dimensions.
    T2, B2, H2 = 25, 3, 100
    x_big = jax.random.normal(jax.random.PRNGKey(1), (T2, B2, H2),
                              dtype=jnp.float32)
    out_big = jax.block_until_ready(
        locked_dropout(x_big, jax.random.PRNGKey(2), dropout=0.25,
                       training=True, target_block_bytes=8 * 1024))
    _check_locked(np.asarray(out_big), np.asarray(x_big), keep=0.75)

    print("KERNEL_OK")
</pallas_src>

<mosaic_0001>
module attributes {stable_mosaic.version = 11 : i64} {
  func.func @locked_dropout_kernel(%arg0: i32, %arg1: i32, %arg2: memref<8x128xf32, #tpu.memory_space<vmem>>, %arg3: memref<8x128xf32, #tpu.memory_space<vmem>>, %arg4: memref<8x128xf32, #tpu.memory_space<vmem>>) attributes {dimension_semantics = [#tpu.dimension_semantics<parallel>, #tpu.dimension_semantics<parallel>], iteration_bounds = array<i64: 1, 1>, scalar_prefetch = 0 : i64, scratch_operands = 0 : i64, tpu.core_type = #tpu.core_type<tc>, window_params = [{transform_indices = @transform_0, window_bounds = array<i64: 8, 128>}, {transform_indices = @transform_1, window_bounds = array<i64: 8, 128>}, {transform_indices = @transform_2, window_bounds = array<i64: 8, 128>}]} {
    %c0 = arith.constant 0 : index
    %c0_0 = arith.constant 0 : index
    %0 = vector.load %arg2[%c0, %c0_0] : memref<8x128xf32, #tpu.memory_space<vmem>>, vector<8x128xf32>
    %c0_1 = arith.constant 0 : index
    %c0_2 = arith.constant 0 : index
    %1 = vector.load %arg3[%c0_1, %c0_2] : memref<8x128xf32, #tpu.memory_space<vmem>>, vector<8x128xf32>
    %2 = vector.shape_cast %0 : vector<8x128xf32> to vector<1x8x128xf32>
    %3 = vector.shape_cast %1 : vector<8x128xf32> to vector<1x8x128xf32>
    %4 = arith.mulf %2, %3 : vector<1x8x128xf32>
    %5 = vector.shape_cast %4 : vector<1x8x128xf32> to vector<8x128xf32>
    %c0_3 = arith.constant 0 : index
    %c0_4 = arith.constant 0 : index
    %6 = vector.load %arg4[%c0_3, %c0_4] : memref<8x128xf32, #tpu.memory_space<vmem>>, vector<8x128xf32>
    tpu.vector_store %arg4[%c0_3, %c0_4], %5 {strides = array<i32>} : memref<8x128xf32, #tpu.memory_space<vmem>>, vector<8x128xf32>,
    return
  }
  func.func @transform_0(%arg0: i32, %arg1: i32) -> (i32, i32) {
    %c0_i32 = arith.constant 0 : i32
    return %arg0, %arg1 : i32, i32
  }
  func.func @transform_1(%arg0: i32, %arg1: i32) -> (i32, i32) {
    %c0_i32 = arith.constant 0 : i32
    %c0_i32_0 = arith.constant 0 : i32
    return %c0_i32, %arg1 : i32, i32
  }
  func.func @transform_2(%arg0: i32, %arg1: i32) -> (i32, i32) {
    %c0_i32 = arith.constant 0 : i32
    return %arg0, %arg1 : i32, i32
  }
}

</mosaic_0001>

<bundles_post_ra>
// kernel: tpu_custom_call.1
= control target key start
LH: loop header
LB: loop body
LE: loop exit
PB: predicated region body
PF: predicated region fallthrough
CT: control target
= control target key end

     0   :  { %7 = vsyncpa [#allocation3], 0  ;;  %s152_s0 = inlined_call_operand.hbm [shape: f32[8,128], index: 0, kind: input, shape index: {}]   ;;  %s153_s1 = inlined_call_operand.hbm [shape: f32[8,128], index: 1, kind: input, shape index: {}]   ;;  %s154_s2 = inlined_call_operand.hbm [shape: f32[8,128], index: 2, kind: output, shape index: {}]  }
   0x1   :  { %8 = vsyncpa [#allocation6], 0 }
   0x2   :  { %9 = vsyncpa [#allocation4], 0  ;;  %s125_s9 = smov [#allocation2]   ;;  %s126_s11 = smov [#allocation5]  }
   0x3   :  { %s16_s10 = sshll.u32 %s125_s9, 4  ;;  %s26_s12 = sshll.u32 %s126_s11, 4  ;;  %s17_s10 = int_to_ptr.vmem [resolvable:$true] %s16_s10  ;;  %s27_s12 = int_to_ptr.vmem [resolvable:$true] %s26_s12 }
   0x4   :  { %s67_s13 = scalar_lea.vmem %s17_s10, 128  ;;  %p72_p1 = scmp.lt.s32.totalorder %s17_s10, %s17_s10 }
   0x5   :  { %p68_p0 = scmp.ne.s32.totalorder %s17_s10, %s67_s13  ;;  %p73_p2 = scmp.lt.s32.totalorder %s67_s13, %s67_s13 }
   0x7   :  { %p74_p3 = por %p73_p2, %p72_p1 }
   0x9   :  { %p75_p4 = pnand %p74_p3, %p68_p0 }
   0xb   :  { %78 = shalt.err (!%p75_p4)
}
   0xc   :  { %19 = dma.hbm_to_vmem [thread:$0]  %s152_s0, 128, %s17_s10, [#allocation3]  }
   0xd   :  { %s87_s16 = scalar_lea.vmem %s27_s12, 128  ;;  %p92_p6 = scmp.lt.s32.totalorder %s27_s12, %s27_s12 }
   0xe   :  { %p88_p5 = scmp.ne.s32.totalorder %s27_s12, %s87_s16  ;;  %p93_p7 = scmp.lt.s32.totalorder %s87_s16, %s87_s16 }
  0x10   :  { %p94_p8 = por %p93_p7, %p92_p6 }
  0x12   :  { %p95_p9 = pnand %p94_p8, %p88_p5 }
  0x14   :  { %98 = shalt.err (!%p95_p9)
}
  0x15   :  { %29 = dma.hbm_to_vmem [thread:$0]  %s153_s1, 128, %s27_s12, [#allocation6]  }
  0x16   :  { %119 = dma.done.wait [#allocation3], 128  }
  0x17   :  { %120 = vsyncadd [#allocation3], 4294967168 }
  0x18   :  { %121 = dma.done.wait [#allocation6], 128  }
  0x19   :  { %122 = vsyncadd [#allocation6], 4294967168  ;;  %s127_s19 = smov [#allocation7]   ;;  %v36_v0 = vld [vmem:[#allocation2] sm:$0xff]  ;;  %v37_v1 = vld [vmem:[#allocation5] sm:$0xff] }
  0x1a   :  { %s46_s20 = sshll.u32 %s127_s19, 4  ;;  %v38_v2 = vmul.f32 %v37_v1, %v36_v0  ;;  %s47_s20 = int_to_ptr.vmem [resolvable:$true] %s46_s20 }
  0x1b   :  { %s99_s0 = scalar_lea.vmem %s47_s20, 128  ;;  %p104_p11 = scmp.lt.s32.totalorder %s47_s20, %s47_s20 }
  0x1c   :  { %39 = vst [vmem:[#allocation7] sm:$0xff] %v38_v2  ;;  %p100_p10 = scmp.ne.s32.totalorder %s47_s20, %s99_s0  ;;  %p105_p12 = scmp.lt.s32.totalorder %s99_s0, %s99_s0 }
  0x1e   :  { %p106_p13 = por %p105_p12, %p104_p11 }
  0x20   :  { %p107_p0 = pnand %p106_p13, %p100_p10 }
  0x22   :  { %110 = shalt.err (!%p107_p0)
}
  0x23   :  { %49 = dma.vmem_to_hbm [thread:$0]  %s47_s20, 128, %s154_s2, [#allocation4]  }
  0x24   :  { %123 = dma.done.wait [#allocation4], 128  }
  0x25   :  { %124 = vsyncadd [#allocation4], 4294967168 }
  0x26   :  { %53 = vsyncpa [#allocation3], 1 }
  0x27   :  { %54 = vsyncpa [#allocation6], 1 }
  0x28   :  { %55 = vsyncpa [#allocation4], 1 }

</bundles_post_ra>
